<compile_context>
chip_gen: v7x
topology: tpu7x:2x2x1
jax: 0.10.0
libtpu: 0.0.40
codegen_flags: <defaults>
</compile_context>

<pallas_src>
import jax
import jax.numpy as jnp
from jax.experimental import pallas as pl
from jax.experimental.pallas import tpu as pltpu


def _round_up(x, m):
    return (x + m - 1) // m * m


def _xw_kernel(x_ref, w1_ref, xw_ref):
    # Feature transform X @ W1, computed once per row-tile (bf16 in, f32 acc,
    # bf16 out so the main kernel reads bf16 MXU operands).
    xw_ref[...] = jnp.dot(
        x_ref[...], w1_ref[...], preferred_element_type=jnp.float32
    ).astype(xw_ref.dtype)


def _gcn_agg_kernel(a_ref, xw_ref, b1_ref, w2_ref, b2_ref, h_ref, z_ref, acc_ref):
    k = pl.program_id(1)

    @pl.when(k == 0)
    def _():
        acc_ref[...] = jnp.zeros_like(acc_ref)

    # A_hat row-tile @ XW k-tile  (bf16 x bf16 -> f32 accumulate on MXU)
    acc_ref[...] += jnp.dot(
        a_ref[...], xw_ref[...], preferred_element_type=jnp.float32
    )

    @pl.when(k == pl.num_programs(1) - 1)
    def _():
        # Fused epilogue: bias + ReLU + Linear head, all f32, lane-dense stores.
        h = jnp.maximum(acc_ref[...] + b1_ref[...], 0.0)
        h_ref[...] = h.astype(h_ref.dtype)
        z = jnp.dot(h, w2_ref[...], preferred_element_type=jnp.float32) + b2_ref[...]
        z_ref[...] = z.astype(z_ref.dtype)


def gcn_forward(a_norm, x, w1, b1, w2, b2, *, tm=256, tk=256):
    """h = relu(A_hat @ (X @ W1) + b1);  z = h @ W2 + b2.

    tm: rows of A_hat per tile.  tk: columns of A_hat (== rows of XW) per
    reduction step.  Both clamp to the padded problem size; raise tk
    (512-2048) for large N, keeping ~2x(A tile + XW tile) under the scoped
    VMEM limit (64 MiB physical on v7x, 128 MiB on v5e/v6e).
    """
    N, F = x.shape
    H = w1.shape[1]
    C = w2.shape[1]

    # Lane-dense padding of the feature dims; zero padding is semantically
    # inert (zero W1/W2 columns/rows, zero bias) and sliced off at the end.
    Hp = _round_up(H, 128)
    Cp = _round_up(C, 128)

    tm = min(tm, _round_up(N, 16))    # bf16 tiles: second-minor multiple of 16
    tk = min(tk, _round_up(N, 128))   # lane axis multiple of 128
    Np_r = _round_up(N, tm)           # padded rows of A_hat
    Np_c = _round_up(N, tk)           # padded cols of A_hat == rows of XW

    f32, bf16 = jnp.float32, jnp.bfloat16
    a_p = jnp.zeros((Np_r, Np_c), bf16).at[:N, :N].set(a_norm.astype(bf16))
    x_p = jnp.zeros((Np_c, F), bf16).at[:N, :].set(x.astype(bf16))
    w1_p = jnp.zeros((F, Hp), bf16).at[:, :H].set(w1.astype(bf16))
    b1_p = jnp.zeros((1, Hp), f32).at[:, :H].set(b1.astype(f32))
    w2_p = jnp.zeros((Hp, Cp), f32).at[:H, :C].set(w2.astype(f32))
    b2_p = jnp.zeros((1, Cp), f32).at[:, :C].set(b2.astype(f32))

    # ---- Stage 1: XW = X @ W1, computed once (hoisted out of the A loop) ----
    xw = pl.pallas_call(
        _xw_kernel,
        out_shape=jax.ShapeDtypeStruct((Np_c, Hp), bf16),
        grid=(Np_c // tk,),
        in_specs=[
            pl.BlockSpec((tk, F), lambda i: (i, 0)),
            pl.BlockSpec((F, Hp), lambda i: (0, 0)),
        ],
        out_specs=pl.BlockSpec((tk, Hp), lambda i: (i, 0)),
        compiler_params=pltpu.CompilerParams(
            dimension_semantics=("parallel",)),
    )(x_p, w1_p)

    # ---- Stage 2: tiled A_hat @ XW with fused bias/ReLU/Linear epilogue ----
    grid = (Np_r // tm, Np_c // tk)
    flops = 2 * Np_r * Np_c * Hp + 2 * Np_r * Hp * Cp
    bytes_accessed = (
        a_p.size * 2 + xw.size * 2          # bf16 inputs
        + (Np_r * Hp + Np_r * Cp) * 4       # f32 outputs
        + (w2_p.size + b1_p.size + b2_p.size) * 4
    )

    h_p, z_p = pl.pallas_call(
        _gcn_agg_kernel,
        out_shape=(
            jax.ShapeDtypeStruct((Np_r, Hp), f32),   # h (padded)
            jax.ShapeDtypeStruct((Np_r, Cp), f32),   # z (padded)
        ),
        grid=grid,
        in_specs=[
            pl.BlockSpec((tm, tk), lambda i, k: (i, k)),   # A_hat tile
            pl.BlockSpec((tk, Hp), lambda i, k: (k, 0)),   # XW tile
            pl.BlockSpec((1, Hp), lambda i, k: (0, 0)),    # b1
            pl.BlockSpec((Hp, Cp), lambda i, k: (0, 0)),   # W2
            pl.BlockSpec((1, Cp), lambda i, k: (0, 0)),    # b2
        ],
        out_specs=(
            pl.BlockSpec((tm, Hp), lambda i, k: (i, 0)),
            pl.BlockSpec((tm, Cp), lambda i, k: (i, 0)),
        ),
        scratch_shapes=[pltpu.VMEM((tm, Hp), f32)],
        compiler_params=pltpu.CompilerParams(
            dimension_semantics=("parallel", "arbitrary")),
        cost_estimate=pl.CostEstimate(
            flops=flops, transcendentals=0, bytes_accessed=bytes_accessed),
    )(a_p, xw, b1_p, w2_p, b2_p)

    return h_p[:N, :H], z_p[:N, :C]


def build_normalized_adjacency(edge_index, num_nodes):
    """Dense A_hat = D^{-1/2} (A + I) D^{-1/2} from edge_index [2, E].

    Uses scatter-ADD (like PyG's GCNConv) so duplicated edges contribute
    multiple times to both the adjacency and the degrees.
    """
    src, dst = edge_index[0], edge_index[1]
    a = jnp.zeros((num_nodes, num_nodes), jnp.float32)
    # message flows src -> dst, aggregated at dst (row index = target node)
    a = a.at[dst, src].add(1.0)
    a = a + jnp.eye(num_nodes, dtype=jnp.float32)  # self loops
    deg = a.sum(axis=1)
    d_inv_sqrt = jnp.where(deg > 0, 1.0 / jnp.sqrt(deg), 0.0)
    return d_inv_sqrt[:, None] * a * d_inv_sqrt[None, :]


if __name__ == "__main__":
    # Small, deterministic synthetic problem (multiple row tiles and multiple
    # reduction steps so the accumulator path is exercised).
    N = 512           # num nodes
    F = 16            # data.num_features
    HIDDEN = 64       # hidden_channels (pads to 128 lanes)
    C = 7             # len(label_mapping) (pads to 128 lanes)
    E = 2048          # directed edges before symmetrization

    key = jax.random.PRNGKey(0)
    kx, ke, kw1, kb1, kw2, kb2 = jax.random.split(key, 6)

    x = jax.random.normal(kx, (N, F), dtype=jnp.float32)

    # Random edges, made symmetric (typical undirected graph input to GCN).
    e = jax.random.randint(ke, (2, E), 0, N, dtype=jnp.int32)
    edge_index = jnp.concatenate([e, e[::-1]], axis=1)  # [2, 2E]

    # Deterministic parameter init (synthetic; shapes match the module).
    w1 = 0.1 * jax.random.normal(kw1, (F, HIDDEN), dtype=jnp.float32)
    b1 = 0.1 * jax.random.normal(kb1, (1, HIDDEN), dtype=jnp.float32)
    w2 = 0.1 * jax.random.normal(kw2, (HIDDEN, C), dtype=jnp.float32)
    b2 = 0.1 * jax.random.normal(kb2, (1, C), dtype=jnp.float32)

    a_norm = build_normalized_adjacency(edge_index, N)

    h, z = gcn_forward(a_norm, x, w1, b1, w2, b2)
    jax.block_until_ready((h, z))

    # Pure-JAX reference using the same bf16-rounded MXU operands
    # (A_hat, X, W1 in bf16; f32 accumulation; f32 bias/ReLU/head).
    hi = jax.lax.Precision.HIGHEST
    a_bf = a_norm.astype(jnp.bfloat16).astype(jnp.float32)
    x_bf = x.astype(jnp.bfloat16).astype(jnp.float32)
    w1_bf = w1.astype(jnp.bfloat16).astype(jnp.float32)
    xw_ref = jnp.dot(x_bf, w1_bf, precision=hi).astype(jnp.bfloat16).astype(jnp.float32)
    h_exp = jnp.maximum(jnp.dot(a_bf, xw_ref, precision=hi) + b1, 0.0)
    z_exp = jnp.dot(h_exp, w2, precision=hi) + b2

    assert h.shape == (N, HIDDEN) and z.shape == (N, C)
    assert jnp.allclose(h, h_exp, atol=2e-2, rtol=2e-2), "h mismatch"
    assert jnp.allclose(z, z_exp, atol=2e-2, rtol=2e-2), "z mismatch"

    print("KERNEL_OK")
</pallas_src>

<mosaic_0001>
module attributes {stable_mosaic.version = 11 : i64} {
  func.func @_xw_kernel(%arg0: i32, %arg1: memref<256x16xbf16, #tpu.memory_space<vmem>>, %arg2: memref<16x128xbf16, #tpu.memory_space<vmem>>, %arg3: memref<256x128xbf16, #tpu.memory_space<vmem>>) attributes {dimension_semantics = [#tpu.dimension_semantics<parallel>], iteration_bounds = array<i64: 2>, scalar_prefetch = 0 : i64, scratch_operands = 0 : i64, tpu.core_type = #tpu.core_type<tc>, window_params = [{transform_indices = @transform_0, window_bounds = array<i64: 256, 16>}, {pipeline_mode = #tpu.pipeline_mode<synchronous>, transform_indices = @transform_1, window_bounds = array<i64: 16, 128>}, {transform_indices = @transform_2, window_bounds = array<i64: 256, 128>}]} {
    %c0 = arith.constant 0 : index
    %c0_0 = arith.constant 0 : index
    %0 = vector.load %arg1[%c0, %c0_0] : memref<256x16xbf16, #tpu.memory_space<vmem>>, vector<256x16xbf16>
    %c0_1 = arith.constant 0 : index
    %c0_2 = arith.constant 0 : index
    %1 = vector.load %arg2[%c0_1, %c0_2] : memref<16x128xbf16, #tpu.memory_space<vmem>>, vector<16x128xbf16>
    %cst = arith.constant dense<0.000000e+00> : vector<256x128xf32>
    %2 = tpu.matmul %0, %1, %cst {dimension_numbers = #tpu.dot_dimension_numbers<[1], [0], [0], [1], [0, 0, 1, 1], [], []>} : vector<256x16xbf16>, vector<16x128xbf16>, vector<256x128xf32> -> vector<256x128xf32>
    %3 = arith.truncf %2 : vector<256x128xf32> to vector<256x128xbf16>
    %c0_3 = arith.constant 0 : index
    %c0_4 = arith.constant 0 : index
    %4 = vector.load %arg3[%c0_3, %c0_4] : memref<256x128xbf16, #tpu.memory_space<vmem>>, vector<256x128xbf16>
    tpu.vector_store %arg3[%c0_3, %c0_4], %3 {strides = array<i32>} : memref<256x128xbf16, #tpu.memory_space<vmem>>, vector<256x128xbf16>,
    return
  }
  func.func @transform_0(%arg0: i32) -> (i32, i32) {
    %c0_i32 = arith.constant 0 : i32
    %c0_i32_0 = arith.constant 0 : i32
    return %arg0, %c0_i32 : i32, i32
  }
  func.func @transform_1(%arg0: i32) -> (i32, i32) {
    %c0_i32 = arith.constant 0 : i32
    %c0_i32_0 = arith.constant 0 : i32
    %c0_i32_1 = arith.constant 0 : i32
    return %c0_i32, %c0_i32_0 : i32, i32
  }
  func.func @transform_2(%arg0: i32) -> (i32, i32) {
    %c0_i32 = arith.constant 0 : i32
    %c0_i32_0 = arith.constant 0 : i32
    return %arg0, %c0_i32 : i32, i32
  }
}

</mosaic_0001>

<bundles_post_ra>
// kernel: tpu_custom_call.1
= control target key start
LH: loop header
LB: loop body
LE: loop exit
PB: predicated region body
PF: predicated region fallthrough
CT: control target
= control target key end

     0   :  { %7 = vsyncpa [#allocation3], 0  ;;  %s1272_s0 = inlined_call_operand.vmem [shape: bf16[512,16], index: 0, kind: input, shape index: {}]   ;;  %s1273_s1 = inlined_call_operand.vmem [shape: bf16[16,128], index: 1, kind: input, shape index: {}]   ;;  %s1274_s2 = inlined_call_operand.hbm [shape: bf16[512,128], index: 2, kind: output, shape index: {}]  }
   0x1   :  { %9 = vsyncpa [#allocation3 + $0x1], 0  ;;  %s1110_s9 = smov 0   ;;  %s1112_s10 = smov 0  }
   0x2   :  { %s1114_s11 = smov 0   ;;  %s1116_s12 = smov 0  }
   0x3 LB: > { %s1131_s13 = sadd.s32 4294967295, %s1090_s12   ;;  %s712_s14 = sadd.s32 4294967294, %s1090_s12   ;;  %s1090_s12 = sphi %s1116_s12, %s1280_s12   ;;  %s1086_s11 = sphi %s1114_s11, %s1279_s11   ;;  %s1082_s10 = sphi %s1112_s10, %s1278_s10   ;;  %s1078_s9 = sphi %s1110_s9, %s1277_s9  }
   0x4   : > { %s1135_s15 = sadd.s32 1, %s1090_s12   ;;  %s69_s16 = sadd.s32 1, %s1086_s11 }
   0x5   : > { %s66_s17 = ssub.s32 %s1090_s12, %s1135_s15  ;;  %p79_p0 = scmp.ne.s32.totalorder %s1086_s11, %s1082_s10 }
   0x6   : > { %p67_p1 = scmp.eq.s32.totalorder %s66_s17, 0  ;;  %p80_p2 = scmp.eq.s32.totalorder %s1131_s13, 1 }
   0x7   : > { %p85_p3 = scmp.ne.s32.totalorder %s1082_s10, %s1078_s9  ;;  %p86_p4 = scmp.eq.s32.totalorder %s712_s14, 1 }
   0x8   : > { %s1146_s18 = scalar_select %p67_p1, %s1086_s11, %s69_s16  }
   0x9   : > { %p1148_p5 = por %p80_p2, %p79_p0  ;;  %p1152_p6 = por %p86_p4, %p85_p3 }
   0xa   : > { %p715_p7 = scmp.ge.s32.totalorder %s1090_s12, 1  ;;  %p116_p8 = scmp.lt.s32.totalorder %s1090_s12, 3 }
   0xc   : > { %p117_p9 = pnand %p715_p7, %p116_p8 }
   0xd   : > { %v1011_v0 = vld [vmem:[%s1273_s1] sm:$0xff] (!%p117_p9)   ;;  %s717_s23 = sshll.u32 (!%p117_p9), %s1131_s13, 5  ;;  %vm266_vm0 = vcmask (!%p117_p9), 130048   ;;  %s135_s28 = sand.u32 (!%p117_p9), 1, %s1082_s10  }
   0xe   : > { %120 = sbr.rel (%p117_p9) target bundleno = 283 (0x11b), region = 28  ;;  %p139_p10 = scmp.lt.s32.totalorder (!%p117_p9), %s717_s23, 63  ;;  %934 = vmatprep.subr.bf16.mxu0 (!%p117_p9), %v1011_v0  ;;  %968 = vmatprep.subr.bf16.mxu1 (!%p117_p9), %v1011_v0 }
   0xf   : > { %935 = vmatpush3.bf16.msra.mxu0 (!%p117_p9), %v1011_v0  ;;  %969 = vmatpush3.bf16.msra.mxu1 (!%p117_p9), %v1011_v0  ;;  %s716_s29 = sshll.u32 (!%p117_p9), %s135_s28, 7  ;;  %s821_s3 = sshll.u32 (!%p117_p9), %s1131_s13, 11 }
  0x10   : > { %s1202_s30 = scalar_lea.vmem (!%p117_p9), [#allocation2], %s716_s29  ;;  %s1221_s7 = scalar_lea.hbm (!%p117_p9), %s1274_s2, %s821_s3 }
  0x11   : > { %s650_s4 = sshll.u32 (!%p117_p9), %s1202_s30, 4  ;;  %s1231_s8 = scalar_lea.sflag (!%p117_p9), [#allocation3], %s135_s28  ;;  %s1223_s4 = int_to_ptr.vmem [resolvable:$true] %s650_s4 }
  0x12   : > { %s1028_s13 = scalar_lea.vmem (!%p117_p9), %s1223_s4, 2048  ;;  %s1092_s14 = smov (!%p117_p9), [#allocation2]  }
  0x13   : > { %p1029_p11 = scmp.ne.s32.totalorder (!%p117_p9), %s1223_s4, %s1028_s13  ;;  %s1032_s16 = sshll.u32 (!%p117_p9), %s1092_s14, 4  ;;  %s1033_s16 = int_to_ptr.vmem [resolvable:$false] %s1032_s16 }
  0x14   : > { %s1034_s17 = scalar_lea.vmem (!%p117_p9), %s1033_s16, 4096  ;;  %p1035_p0 = scmp.lt.s32.totalorder (!%p117_p9), %s1223_s4, %s1033_s16 }
  0x15   : > { %s1282_s23 = smov (!%p139_p10, %s717_s23), 63  ;;  %p1030_p12 = pnand %p1029_p11, %p1148_p5 }
  0x16   : > { %s718_s24 = sshll.u32 %s1282_s23, 2  ;;  %p1036_p1 = scmp.lt.s32.totalorder %s1034_s17, %s1028_s13 }
  0x17   : > { %s1165_s27 = scalar_lea.vmem %s1272_s0, %s718_s24  ;;  %p1031_p13 = pneg %p1030_p12 }
  0x18   : > { %v1012_v1 = vld [vmem:[%s1165_s27] sm:$0xff]   ;;  %v1014_v3 = vld [vmem:[%s1165_s27 + $0x8] sm:$0xff]   ;;  %v1016_v5 = vld [vmem:[%s1165_s27 + $0x10] sm:$0xff]   ;;  %p1037_p2 = por %p1036_p1, %p1035_p0 }
  0x19   : > { %v1013_v2 = vld [vmem:[%s1165_s27 + $0x40] sm:$0xff]   ;;  %936 = vmatprep.mubr.msk.bf16.mxu0 %vm266_vm0, %v1012_v1  ;;  %v1015_v4 = vld [vmem:[%s1165_s27 + $0x48] sm:$0xff]   ;;  %v1017_v6 = vld [vmem:[%s1165_s27 + $0x50] sm:$0xff]  }
  0x1a   : > { %952 = vmatprep.mubr.msk.bf16.mxu1 %vm266_vm0, %v1013_v2  ;;  %937 = vmatmul.mubr.msk.bf16.vlgmr.msra.gmra.mrb[0].mxu0 %vm266_vm0, %v1014_v3  ;;  %v1018_v7 = vld [vmem:[%s1165_s27 + $0x18] sm:$0xff]   ;;  %v1020_v9 = vld [vmem:[%s1165_s27 + $0x20] sm:$0xff]   ;;  %v1022_v11 = vld [vmem:[%s1165_s27 + $0x28] sm:$0xff]   ;;  %p1038_p3 = pnand %p1037_p2, %p1031_p13 }
  0x1b   : > { %953 = vmatmul.mubr.msk.bf16.vlgmr.msra.gmra.mrb[0].mxu1 %vm266_vm0, %v1015_v4  ;;  %940 = vmatprep.mubr.msk.bf16.mxu0 %vm266_vm0, %v1016_v5  ;;  %v1019_v8 = vld [vmem:[%s1165_s27 + $0x58] sm:$0xff]   ;;  %v1021_v10 = vld [vmem:[%s1165_s27 + $0x60] sm:$0xff]   ;;  %v1023_v12 = vld [vmem:[%s1165_s27 + $0x68] sm:$0xff]  }
  0x1c   : > { %956 = vmatprep.mubr.msk.bf16.mxu1 %vm266_vm0, %v1017_v6  ;;  %v1024_v13 = vld [vmem:[%s1165_s27 + $0x30] sm:$0xff]   ;;  %v1026_v15 = vld [vmem:[%s1165_s27 + $0x38] sm:$0xff]  }
  0x1d   : > { %v1025_v14 = vld [vmem:[%s1165_s27 + $0x70] sm:$0xff]   ;;  %v1027_v16 = vld [vmem:[%s1165_s27 + $0x78] sm:$0xff]  }
  0x22   : > { %941 = vmatmul.mubr.msk.bf16.gmra.mrb[4].mxu0 %vm266_vm0, %v1018_v7 }
  0x23   : > { %957 = vmatmul.mubr.msk.bf16.gmra.mrb[4].mxu1 %vm266_vm0, %v1019_v8  ;;  %944 = vmatprep.mubr.msk.bf16.mxu0 %vm266_vm0, %v1020_v9 }
  0x24   : > { %960 = vmatprep.mubr.msk.bf16.mxu1 %vm266_vm0, %v1021_v10 }
  0x2a   : > { %945 = vmatmul.mubr.msk.bf16.gmra.mrb[8].mxu0 %vm266_vm0, %v1022_v11 }
  0x2b   : > { %961 = vmatmul.mubr.msk.bf16.gmra.mrb[8].mxu1 %vm266_vm0, %v1023_v12  ;;  %948 = vmatprep.mubr.msk.bf16.mxu0 %vm266_vm0, %v1024_v13 }
  0x2c   : > { %964 = vmatprep.mubr.msk.bf16.mxu1 %vm266_vm0, %v1025_v14 }
  0x32   : > { %949 = vmatmul.mubr.msk.bf16.gmra.mrb[12].mxu0 %vm266_vm0, %v1026_v15 }
  0x33   : > { %965 = vmatmul.mubr.msk.bf16.gmra.mrb[12].mxu1 %vm266_vm0, %v1027_v16 }
  0xed   : > { %v938_v17 = vpop.f32.mrb[0].mxu0 }
  0xee   : > { %v954_v18 = vpop.f32.mrb[0].mxu1  ;;  %v349_v19 = vpop.f32.mrb[1].mxu0 }
  0xef   : > { %v413_v20 = vpop.f32.mrb[1].mxu1  ;;  %v939_v21 = vpop.f32.mrb[2].mxu0 }
  0xf0   : > { %v830_v22 = vpack.c.bf16 %v939_v21, %v938_v17  ;;  %v955_v23 = vpop.f32.mrb[2].mxu1  ;;  %v352_v24 = vpop.f32.mrb[3].mxu0 }
  0xf1   : > { %v870_v25 = vpack.c.bf16 %v955_v23, %v954_v18  ;;  %v825_v26 = vpack.c.bf16 %v352_v24, %v349_v19  ;;  %v416_v27 = vpop.f32.mrb[3].mxu1 }
  0xf2   : > { %902 = vst [vmem:[%s1202_s30 + $0x8] sm:$0xff] %v830_v22   ;;  %v865_v28 = vpack.c.bf16 %v416_v27, %v413_v20 }
  0xf3   : > { %910 = vst [vmem:[%s1202_s30 + $0x48] sm:$0xff] %v870_v25   ;;  %826 = vst [vmem:[%s1202_s30] sm:$0xff] %v825_v26  }
  0xf4   : > { %909 = vst [vmem:[%s1202_s30 + $0x40] sm:$0xff] %v865_v28  }
  0xf5   : > { %v942_v29 = vpop.f32.mrb[4].mxu0 }
  0xf6   : > { %v958_v30 = vpop.f32.mrb[4].mxu1  ;;  %v365_v31 = vpop.f32.mrb[5].mxu0 }
  0xf7   : > { %v429_v32 = vpop.f32.mrb[5].mxu1  ;;  %v943_v33 = vpop.f32.mrb[6].mxu0 }
  0xf8   : > { %v840_v34 = vpack.c.bf16 %v943_v33, %v942_v29  ;;  %v959_v35 = vpop.f32.mrb[6].mxu1  ;;  %v368_v36 = vpop.f32.mrb[7].mxu0 }
  0xf9   : > { %v880_v37 = vpack.c.bf16 %v959_v35, %v958_v30  ;;  %v835_v38 = vpack.c.bf16 %v368_v36, %v365_v31  ;;  %v432_v39 = vpop.f32.mrb[7].mxu1 }
  0xfa   : > { %904 = vst [vmem:[%s1202_s30 + $0x18] sm:$0xff] %v840_v34   ;;  %v875_v40 = vpack.c.bf16 %v432_v39, %v429_v32 }
  0xfb   : > { %912 = vst [vmem:[%s1202_s30 + $0x58] sm:$0xff] %v880_v37   ;;  %903 = vst [vmem:[%s1202_s30 + $0x10] sm:$0xff] %v835_v38  }
  0xfc   : > { %911 = vst [vmem:[%s1202_s30 + $0x50] sm:$0xff] %v875_v40  }
  0xfd   : > { %v946_v41 = vpop.f32.mrb[8].mxu0 }
  0xfe   : > { %v962_v42 = vpop.f32.mrb[8].mxu1  ;;  %v381_v43 = vpop.f32.mrb[9].mxu0 }
  0xff   : > { %v445_v44 = vpop.f32.mrb[9].mxu1  ;;  %v947_v45 = vpop.f32.mrb[10].mxu0 }
 0x100   : > { %v850_v46 = vpack.c.bf16 %v947_v45, %v946_v41  ;;  %v963_v47 = vpop.f32.mrb[10].mxu1  ;;  %v384_v48 = vpop.f32.mrb[11].mxu0 }
 0x101   : > { %v890_v49 = vpack.c.bf16 %v963_v47, %v962_v42  ;;  %v845_v50 = vpack.c.bf16 %v384_v48, %v381_v43  ;;  %v448_v51 = vpop.f32.mrb[11].mxu1 }
 0x102   : > { %906 = vst [vmem:[%s1202_s30 + $0x28] sm:$0xff] %v850_v46   ;;  %v885_v52 = vpack.c.bf16 %v448_v51, %v445_v44 }
 0x103   : > { %914 = vst [vmem:[%s1202_s30 + $0x68] sm:$0xff] %v890_v49   ;;  %905 = vst [vmem:[%s1202_s30 + $0x20] sm:$0xff] %v845_v50  }
 0x104   : > { %913 = vst [vmem:[%s1202_s30 + $0x60] sm:$0xff] %v885_v52  }
 0x105   : > { %v950_v53 = vpop.f32.mrb[12].mxu0 }
 0x106   : > { %v966_v54 = vpop.f32.mrb[12].mxu1  ;;  %v397_v55 = vpop.f32.mrb[13].mxu0 }
 0x107   : > { %v461_v56 = vpop.f32.mrb[13].mxu1  ;;  %v951_v57 = vpop.f32.mrb[14].mxu0 }
 0x108   : > { %v860_v58 = vpack.c.bf16 %v951_v57, %v950_v53  ;;  %v967_v59 = vpop.f32.mrb[14].mxu1  ;;  %v400_v60 = vpop.f32.mrb[15].mxu0 }
 0x109   : > { %v900_v61 = vpack.c.bf16 %v967_v59, %v966_v54  ;;  %v855_v62 = vpack.c.bf16 %v400_v60, %v397_v55  ;;  %v464_v63 = vpop.f32.mrb[15].mxu1 }
 0x10a   : > { %908 = vst [vmem:[%s1202_s30 + $0x38] sm:$0xff] %v860_v58   ;;  %v895_v0 = vpack.c.bf16 %v464_v63, %v461_v56 }
 0x10b   : > { %916 = vst [vmem:[%s1202_s30 + $0x78] sm:$0xff] %v900_v61   ;;  %907 = vst [vmem:[%s1202_s30 + $0x30] sm:$0xff] %v855_v62  }
 0x10c   : > { %915 = vst [vmem:[%s1202_s30 + $0x70] sm:$0xff] %v895_v0  }
 0x10d   : > { %1041 = shalt.err (!%p1038_p3)
}
 0x10e   : > { %s1042_s21 = scalar_lea.hbm %s1221_s7, 2048  ;;  %s1046_s24 = scalar_lea.hbm %s1274_s2, 4096 }
 0x10f   : > { %p1043_p4 = scmp.ne.s32.totalorder %s1221_s7, %s1042_s21  ;;  %p1047_p9 = scmp.lt.u32.totalorder %s1221_s7, %s1274_s2 }
 0x110   : > { %p1048_p10 = scmp.lt.u32.totalorder %s1046_s24, %s1042_s21  ;;  %p1050_p12 = scmp.lt.u32.totalorder %s1042_s21, %s1221_s7 }
 0x111   : > { %p1044_p7 = pnand %p1043_p4, %p1148_p5 }
 0x112   : > { %p1049_p11 = por %p1048_p10, %p1047_p9 }
 0x113   : > { %p1045_p8 = pneg %p1044_p7 }
 0x114   : > { %p1051_p13 = por %p1050_p12, %p1049_p11 }
 0x116   : > { %p1052_p0 = pnand %p1051_p13, %p1045_p8 }
 0x118   : > { %1055 = shalt.err (!%p1052_p0)
}
 0x119   : > { %s1093_s27 = smov 64   ;;  %s1094_s28 = smov 4  }
 0x11a   : > { %970 = dma.vmem_to_hbm [thread:$0]  (%p1148_p5), %s1223_s4, 2048, %s1221_s7, %s1231_s8, %s1093_s27, %s1093_s27, %s1094_s28  }
 0x11b PF: > { %p976_p1 = scmp.ge.s32.totalorder %s1090_s12, 2  ;;  %s665_s29 = sand.u32 1, %s1078_s9  }
 0x11c   : > { %s666_s30 = scalar_lea.sflag [#allocation3], %s665_s29 }
 0x11d   : > { %p973_p2 = pnand %p976_p1, %p1152_p6 }
 0x11f   : > { %1073 = dma.done.wait (!%p973_p2), %s666_s30, 2048  }
 0x120   : > { %1075 = vsyncadd (!%p973_p2), %s666_s30, 4294965248  ;;  %p12_p3 = scmp.ge.s32.totalorder %s1135_s15, 4   ;;  %s1277_s9 = smov %s1082_s10 }
 0x121   : > { %s1278_s10 = smov %s1086_s11  ;;  %s1279_s11 = smov %s1146_s18 }
 0x122   : > { %s1280_s12 = smov %s1135_s15  ;;  %14 = sbr.rel (!%p12_p3) target bundleno = 3 (0x3), region = 63 }
 0x129   :  { %671 = vsyncpa [#allocation3], 1 }
 0x12a   :  { %673 = vsyncpa [#allocation3 + $0x1], 1 }

</bundles_post_ra>
